<compile_context>
chip_gen: v7x
topology: tpu7x:2x2x1
jax: 0.10.0
libtpu: 0.0.40
codegen_flags: <defaults>
</compile_context>

<pallas_src>
import functools

import jax
import jax.numpy as jnp
from jax.experimental import pallas as pl
from jax.experimental.pallas import tpu as pltpu


def _round_up(n, m):
    return ((n + m - 1) // m) * m


# ----------------------------------------------------------------------------
# Kernels
# ----------------------------------------------------------------------------
def _fused_kernel(x_ref, wcat_ref, b1_ref, w2_ref, b2_ref, o_ref, *, hidden):
    """y^T = W_lin @ x^T + W2 @ tanh(W1 @ x^T + b1) + b2   (batch on lanes)."""
    x = x_ref[...]                                              # (n_x, TILE_B)
    # Single MXU pass sharing x across both branches:
    #   rows [0:H]   -> hidden pre-activation (W1 @ x^T)
    #   rows [H:H+ny]-> linear branch         (W_lin @ x^T)
    z = jnp.dot(wcat_ref[...], x,
                preferred_element_type=jnp.float32)             # (H+n_y, TILE_B) f32
    h = jnp.tanh(z[:hidden, :] + b1_ref[...])                   # f32 elementwise (v5e-safe)
    y_lin = z[hidden:, :]                                       # (n_y, TILE_B) f32
    y_nl = jnp.dot(w2_ref[...], h.astype(w2_ref.dtype),
                   preferred_element_type=jnp.float32)          # (n_y, TILE_B) f32
    o_ref[...] = (y_lin + y_nl + b2_ref[...]).astype(o_ref.dtype)


def _lin_only_kernel(x_ref, wlin_ref, o_ref):
    """nl_on=False path: y^T = W_lin @ x^T."""
    o_ref[...] = jnp.dot(wlin_ref[...], x_ref[...],
                         preferred_element_type=jnp.float32).astype(o_ref.dtype)


# ----------------------------------------------------------------------------
# One-time parameter packing (do this at model-build time, not per step)
# ----------------------------------------------------------------------------
def pack_params(w_lin, w1, b1, w2, b2, compute_dtype=None):
    """Repack PyTorch-layout parameters into kernel layout (no transposes)."""
    w_lin = jnp.asarray(w_lin)
    w1 = jnp.asarray(w1)
    w2 = jnp.asarray(w2)
    cd = jnp.dtype(compute_dtype) if compute_dtype is not None else w_lin.dtype
    return {
        "w_cat": jnp.concatenate([w1, w_lin], axis=0).astype(cd),   # (H+n_y, n_x)
        "b1": jnp.asarray(b1, jnp.float32).reshape(-1, 1),          # (H, 1)   f32
        "w2": w2.astype(cd),                                        # (n_y, H)
        "b2": jnp.asarray(b2, jnp.float32).reshape(-1, 1),          # (n_y, 1) f32
        "w_lin": w_lin.astype(cd),                                  # (n_y, n_x) for nl_on=False
        "hidden": int(w1.shape[0]),
        "n_y": int(w_lin.shape[0]),
    }


# ----------------------------------------------------------------------------
# Transposed (lane-dense) entry point: x_t (n_x, B) -> y_t (n_y, B)
# ----------------------------------------------------------------------------
def neural_lin_output_t(x_t, params, *, nl_on=True, tile_b=2048, out_dtype=None):
    n_x, b = x_t.shape
    n_y = params["n_y"]
    hidden = params["hidden"]
    out_dtype = out_dtype if out_dtype is not None else x_t.dtype

    # Batch is the 128-lane axis: tiles must be multiples of 128.
    tile = min(int(tile_b), _round_up(max(b, 1), 128))
    tile = _round_up(tile, 128)
    bp = _round_up(b, tile)
    if bp != b:
        x_t = jnp.pad(x_t, ((0, 0), (0, bp - b)))
    grid = (bp // tile,)

    const = lambda i: (0, 0)
    batch = lambda i: (0, i)

    cparams = pltpu.CompilerParams(
        dimension_semantics=("parallel",),     # independent batch tiles -> megacore on v7x
        vmem_limit_bytes=32 * 1024 * 1024,     # explicit; safe within v7x's 64 MiB VMEM
    )

    if nl_on:
        out = pl.pallas_call(
            functools.partial(_fused_kernel, hidden=hidden),
            out_shape=jax.ShapeDtypeStruct((n_y, bp), out_dtype),
            grid=grid,
            in_specs=[
                pl.BlockSpec((n_x, tile), batch),             # x^T tile (pipelined)
                pl.BlockSpec((hidden + n_y, n_x), const),     # [W1; W_lin]  (resident)
                pl.BlockSpec((hidden, 1), const),             # b1           (resident)
                pl.BlockSpec((n_y, hidden), const),           # W2           (resident)
                pl.BlockSpec((n_y, 1), const),                # b2           (resident)
            ],
            out_specs=pl.BlockSpec((n_y, tile), batch),       # lane-dense output tile
            compiler_params=cparams,
        )(x_t.astype(params["w_cat"].dtype), params["w_cat"], params["b1"],
          params["w2"], params["b2"])
    else:
        out = pl.pallas_call(
            _lin_only_kernel,
            out_shape=jax.ShapeDtypeStruct((n_y, bp), out_dtype),
            grid=grid,
            in_specs=[
                pl.BlockSpec((n_x, tile), batch),
                pl.BlockSpec((n_y, n_x), const),
            ],
            out_specs=pl.BlockSpec((n_y, tile), batch),
            compiler_params=cparams,
        )(x_t.astype(params["w_lin"].dtype), params["w_lin"])

    return out[:, :b] if bp != b else out


# ----------------------------------------------------------------------------
# Drop-in wrapper matching NeuralLinOutput.forward: x (B, n_x) -> y (B, n_y)
# ----------------------------------------------------------------------------
def neural_lin_output(x, w_lin, w1, b1, w2, b2, *, nl_on=True, tile_b=2048,
                      compute_dtype=None):
    x = jnp.asarray(x)
    params = pack_params(w_lin, w1, b1, w2, b2, compute_dtype=compute_dtype)
    y_t = neural_lin_output_t(x.T, params, nl_on=nl_on, tile_b=tile_b,
                              out_dtype=x.dtype)
    return y_t.T


def neural_lin_output_ref(x, w_lin, w1, b1, w2, b2, nl_on=True):
    """Pure-JAX reference mirroring the PyTorch forward."""
    y = x @ w_lin.T
    if nl_on:
        y = y + (jnp.tanh(x @ w1.T + b1) @ w2.T + b2)
    return y


if __name__ == "__main__":
    # Shapes consistent with the module defaults: n_x=4, n_y=2, hidden=16.
    B, n_x, n_y, hidden = 8, 4, 2, 16

    key = jax.random.PRNGKey(0)
    kx, k0, k1, k2, k3, k4 = jax.random.split(key, 6)

    def uinit(k, shape, fan_in):
        bound = 1.0 / (fan_in ** 0.5)
        return jax.random.uniform(k, shape, jnp.float32, -bound, bound)

    x = jax.random.normal(kx, (B, n_x), dtype=jnp.float32)
    w_lin = uinit(k0, (n_y, n_x), n_x)        # lin.weight (bias=False)
    w1 = uinit(k1, (hidden, n_x), n_x)        # net[0].weight
    b1 = uinit(k2, (hidden,), n_x)            # net[0].bias
    w2 = uinit(k3, (n_y, hidden), hidden)     # net[2].weight
    b2 = uinit(k4, (n_y,), hidden)            # net[2].bias

    # 1) Drop-in forward at the module's native small batch.
    y = jax.block_until_ready(neural_lin_output(x, w_lin, w1, b1, w2, b2))
    y_ref = neural_lin_output_ref(x, w_lin, w1, b1, w2, b2)
    assert y.shape == (B, n_y)
    assert jnp.allclose(y, y_ref, atol=1e-5, rtol=1e-5), (y, y_ref)

    # 2) Sequence-batched call (how this should be used inside a rollout):
    #    pack once, run on a (n_x, T*B) slab; ragged size + small tile exercises
    #    padding and the multi-step pipelined batch grid.
    T = 37
    xs = jax.random.normal(jax.random.PRNGKey(1), (T * B, n_x), dtype=jnp.float32)
    params = pack_params(w_lin, w1, b1, w2, b2)
    ys_t = jax.block_until_ready(neural_lin_output_t(xs.T, params, tile_b=128))
    ys_ref = neural_lin_output_ref(xs, w_lin, w1, b1, w2, b2)
    assert ys_t.shape == (n_y, T * B)
    assert jnp.allclose(ys_t.T, ys_ref, atol=1e-5, rtol=1e-5)

    # 3) nl_on=False path (linear branch only).
    y_lin_only = jax.block_until_ready(
        neural_lin_output(x, w_lin, w1, b1, w2, b2, nl_on=False))
    assert jnp.allclose(y_lin_only, x @ w_lin.T, atol=1e-5, rtol=1e-5)

    print("KERNEL_OK")
</pallas_src>

<mosaic_0001>
module attributes {stable_mosaic.version = 11 : i64} {
  func.func @_fused_kernel(%arg0: i32, %arg1: memref<4x128xf32, #tpu.memory_space<vmem>>, %arg2: memref<18x4xf32, #tpu.memory_space<vmem>>, %arg3: memref<16x1xf32, #tpu.memory_space<vmem>>, %arg4: memref<2x16xf32, #tpu.memory_space<vmem>>, %arg5: memref<2x1xf32, #tpu.memory_space<vmem>>, %arg6: memref<2x128xf32, #tpu.memory_space<vmem>>) attributes {dimension_semantics = [#tpu.dimension_semantics<parallel>], iteration_bounds = array<i64: 1>, scalar_prefetch = 0 : i64, scratch_operands = 0 : i64, tpu.core_type = #tpu.core_type<tc>, window_params = [{transform_indices = @transform_0, window_bounds = array<i64: 4, 128>}, {pipeline_mode = #tpu.pipeline_mode<synchronous>, transform_indices = @transform_1, window_bounds = array<i64: 18, 4>}, {pipeline_mode = #tpu.pipeline_mode<synchronous>, transform_indices = @transform_2, window_bounds = array<i64: 16, 1>}, {pipeline_mode = #tpu.pipeline_mode<synchronous>, transform_indices = @transform_3, window_bounds = array<i64: 2, 16>}, {pipeline_mode = #tpu.pipeline_mode<synchronous>, transform_indices = @transform_4, window_bounds = array<i64: 2, 1>}, {transform_indices = @transform_5, window_bounds = array<i64: 2, 128>}]} {
    %c0 = arith.constant 0 : index
    %c0_0 = arith.constant 0 : index
    %0 = vector.load %arg1[%c0, %c0_0] : memref<4x128xf32, #tpu.memory_space<vmem>>, vector<4x128xf32>
    %c0_1 = arith.constant 0 : index
    %c0_2 = arith.constant 0 : index
    %1 = vector.load %arg2[%c0_1, %c0_2] : memref<18x4xf32, #tpu.memory_space<vmem>>, vector<18x4xf32>
    %cst = arith.constant dense<0.000000e+00> : vector<18x128xf32>
    %2 = tpu.matmul %1, %0, %cst {dimension_numbers = #tpu.dot_dimension_numbers<[1], [0], [0], [1], [0, 0, 1, 1], [], []>} : vector<18x4xf32>, vector<4x128xf32>, vector<18x128xf32> -> vector<18x128xf32>
    %3 = vector.extract_strided_slice %2 {offsets = [0, 0], sizes = [16, 128], strides = [1, 1]} : vector<18x128xf32> to vector<16x128xf32>
    %c0_3 = arith.constant 0 : index
    %c0_4 = arith.constant 0 : index
    %4 = vector.load %arg3[%c0_3, %c0_4] : memref<16x1xf32, #tpu.memory_space<vmem>>, vector<16x1xf32>
    %5 = vector.broadcast %4 : vector<16x1xf32> to vector<16x128xf32>
    %6 = arith.addf %3, %5 : vector<16x128xf32>
    %7 = math.tanh %6 : vector<16x128xf32>
    %8 = vector.extract_strided_slice %2 {offsets = [16, 0], sizes = [2, 128], strides = [1, 1]} : vector<18x128xf32> to vector<2x128xf32>
    %c0_5 = arith.constant 0 : index
    %c0_6 = arith.constant 0 : index
    %9 = vector.load %arg4[%c0_5, %c0_6] : memref<2x16xf32, #tpu.memory_space<vmem>>, vector<2x16xf32>
    %cst_7 = arith.constant dense<0.000000e+00> : vector<2x128xf32>
    %10 = tpu.matmul %9, %7, %cst_7 {dimension_numbers = #tpu.dot_dimension_numbers<[1], [0], [0], [1], [0, 0, 1, 1], [], []>} : vector<2x16xf32>, vector<16x128xf32>, vector<2x128xf32> -> vector<2x128xf32>
    %11 = arith.addf %8, %10 : vector<2x128xf32>
    %c0_8 = arith.constant 0 : index
    %c0_9 = arith.constant 0 : index
    %12 = vector.load %arg5[%c0_8, %c0_9] : memref<2x1xf32, #tpu.memory_space<vmem>>, vector<2x1xf32>
    %13 = vector.broadcast %12 : vector<2x1xf32> to vector<2x128xf32>
    %14 = arith.addf %11, %13 : vector<2x128xf32>
    %c0_10 = arith.constant 0 : index
    %c0_11 = arith.constant 0 : index
    %15 = vector.load %arg6[%c0_10, %c0_11] : memref<2x128xf32, #tpu.memory_space<vmem>>, vector<2x128xf32>
    tpu.vector_store %arg6[%c0_10, %c0_11], %14 {strides = array<i32>} : memref<2x128xf32, #tpu.memory_space<vmem>>, vector<2x128xf32>,
    return
  }
  func.func @transform_0(%arg0: i32) -> (i32, i32) {
    %c0_i32 = arith.constant 0 : i32
    %c0_i32_0 = arith.constant 0 : i32
    return %c0_i32, %arg0 : i32, i32
  }
  func.func @transform_1(%arg0: i32) -> (i32, i32) {
    %c0_i32 = arith.constant 0 : i32
    %c0_i32_0 = arith.constant 0 : i32
    %c0_i32_1 = arith.constant 0 : i32
    return %c0_i32, %c0_i32_0 : i32, i32
  }
  func.func @transform_2(%arg0: i32) -> (i32, i32) {
    %c0_i32 = arith.constant 0 : i32
    %c0_i32_0 = arith.constant 0 : i32
    %c0_i32_1 = arith.constant 0 : i32
    return %c0_i32, %c0_i32_0 : i32, i32
  }
  func.func @transform_3(%arg0: i32) -> (i32, i32) {
    %c0_i32 = arith.constant 0 : i32
    %c0_i32_0 = arith.constant 0 : i32
    %c0_i32_1 = arith.constant 0 : i32
    return %c0_i32, %c0_i32_0 : i32, i32
  }
  func.func @transform_4(%arg0: i32) -> (i32, i32) {
    %c0_i32 = arith.constant 0 : i32
    %c0_i32_0 = arith.constant 0 : i32
    %c0_i32_1 = arith.constant 0 : i32
    return %c0_i32, %c0_i32_0 : i32, i32
  }
  func.func @transform_5(%arg0: i32) -> (i32, i32) {
    %c0_i32 = arith.constant 0 : i32
    %c0_i32_0 = arith.constant 0 : i32
    return %c0_i32, %arg0 : i32, i32
  }
}

</mosaic_0001>

<bundles_post_ra>
// kernel: tpu_custom_call.1
= control target key start
LH: loop header
LB: loop body
LE: loop exit
PB: predicated region body
PF: predicated region fallthrough
CT: control target
= control target key end

     0   :  { %vm35_vm0 = vcmask 1043456   ;;  %v303_v2 = vmov 0.0   ;;  %vm304_vm1 = vmmov 0   ;;  %vm25_vm2 = vcmask 31744   ;;  %s383_s0 = inlined_call_operand.vmem [shape: f32[4,128], index: 0, kind: input, shape index: {}]   ;;  %s384_s1 = inlined_call_operand.vmem [shape: f32[18,4], index: 1, kind: input, shape index: {}]   ;;  %s385_s2 = inlined_call_operand.vmem [shape: f32[16,1], index: 2, kind: input, shape index: {}]   ;;  %s386_s3 = inlined_call_operand.vmem [shape: f32[2,16], index: 3, kind: input, shape index: {}]   ;;  %s387_s4 = inlined_call_operand.vmem [shape: f32[2,1], index: 4, kind: input, shape index: {}]   ;;  %s388_s5 = inlined_call_operand.hbm [shape: f32[2,128], index: 5, kind: output, shape index: {}]  }
   0x1   :  { %v21_v0 = vld [vmem:[%s383_s0] sm:$0xf]  ;;  %245 = vmatprep.subr.mxu0 %v303_v2  ;;  %247 = vmatprep.mubr.msk.f32.mxu0 %vm304_vm1, %v303_v2  ;;  %v305_v4 = vmov 0  }
   0x2   :  { %v22_v1 = vld [vmem:[%s384_s1] sm:$0xff]  ;;  %246 = vmatpush3.msk.msra.mxu0 %vm35_vm0, %v21_v0  ;;  %273 = vset.pattern.permute.xlu0 %v305_v4 }
   0x3   :  { %v119_v3 = vld [vmem:[%s385_s2] sm:$0xff] }
   0x4   :  { %10 = vsyncpa [#allocation3], 0  ;;  %248 = vmatmul.mubr.msk.f32.vlgmr.msra.gmra.mrb[0].mxu0 %vm25_vm2, %v22_v1  ;;  %123 = vperm.xlu0 %273, %v119_v3   ;;  %v23_v5 = vld [vmem:[%s384_s1 + $0x8] sm:$0xff]  ;;  %v24_v7 = vld [vmem:[%s384_s1 + $0x10] sm:$0x3]  ;;  %v306_v8 = vmov 0.0|0.0  }
   0x5   :  { %250 = vmatprep.mubr.msk.f32.mxu0 %vm304_vm1, %v303_v2  ;;  %v120_v6 = vld [vmem:[%s385_s2 + $0x8] sm:$0xff]  ;;  %266 = vmatprep.subr.mxu1 %v303_v2  ;;  %v211_v9 = vld [vmem:[%s387_s4] sm:$0x3]  ;;  %vm136_vm3 = vcmask 130048   ;;  %s307_s4 = smov [#allocation2]  }
   0x6   :  { %267 = vmatpush3.msk.msra.mxu1 %vm35_vm0, %v21_v0  ;;  %253 = vmatprep.mubr.msk.f32.mxu1 %vm304_vm1, %v303_v2  ;;  %v135_v21 = vld [vmem:[%s386_s3] sm:$0x3]  ;;  %s225_s6 = sshll.u32 %s307_s4, 4  ;;  %s226_s6 = int_to_ptr.vmem [resolvable:$true] %s225_s6 }
   0x7   :  { %274 = vset.pattern.permute.xlu1 %v305_v4  ;;  %254 = vmatmul.mubr.msk.f32.vlgmr.msra.gmra.mrb[0].mxu1 %vm25_vm2, %v24_v7  ;;  %s279_s7 = scalar_lea.vmem %s226_s6, 32  ;;  %p284_p1 = scmp.lt.s32.totalorder %s226_s6, %s226_s6 }
   0x8   :  { %251 = vmatmul.mubr.msk.f32.gmra.mrb[2].mxu0 %vm25_vm2, %v23_v5  ;;  %128 = vperm.xlu0 %273, %v120_v6   ;;  %p280_p0 = scmp.ne.s32.totalorder %s226_s6, %s279_s7  ;;  %p285_p2 = scmp.lt.s32.totalorder %s279_s7, %s279_s7 }
   0x9   :  { %263 = vmatprep.subr.bf16.mxu1 %v306_v8  ;;  %260 = vmatprep.mubr.msk.f32.mxu1 %vm304_vm1, %v303_v2 }
   0xa   :  { %214 = vperm.xlu1 %274, %v211_v9   ;;  %p286_p3 = por %p285_p2, %p284_p1 }
   0xc   :  { %p287_p4 = pnand %p286_p3, %p280_p0 }
  0x83   :  { %v124_v10 = vpop.permute.xlu0 %123 }
  0x87   :  { %v129_v14 = vpop.permute.xlu0 %128 }
  0x89   :  { %v215_v25 = vpop.permute.xlu1 %214 }
  0xd7   :  { %v105_v11 = vpop.f32.mrb[0].mxu0 }
  0xd8   :  { %v249_v12 = vpop.f32.mrb[1].mxu0  ;;  %v131_v13 = vadd.f32 %v124_v10, %v105_v11 }
  0xda   :  { %275 = vtanh.f32 %v131_v13  ;;  %v115_v22 = vpop.f32.mrb[0].mxu1 }
  0xdb   :  { %v110_v15 = vpop.f32.mrb[2].mxu0  ;;  %v255_v23 = vpop.f32.mrb[1].mxu1 }
  0xdc   :  { %v132_v16 = vadd.f32 %v129_v14, %v110_v15  ;;  %v252_v17 = vpop.f32.mrb[3].mxu0 }
  0xde   :  { %277 = vtanh.f32 %v132_v16 }
  0xe4   :  { %v276_v18 = vpop.eup %275 }
  0xe8   :  { %v278_v19 = vpop.eup %277 }
  0xe9   :  { %v264_v20 = vpack.c.bf16 %v278_v19, %v276_v18 }
  0xeb   :  { %265 = vmatpush3.bf16.msra.mxu1 %v264_v20 }
  0xee   :  { %261 = vmatmul.mubr.msk.f32.vlgmr.msra.gmra.mrb[2].mxu1 %vm136_vm3, %v135_v21 }
 0x1c1   :  { %v206_v24 = vpop.f32.mrb[2].mxu1 }
 0x1c2   :  { %v210_v26 = vadd.f32 %v206_v24, %v115_v22  ;;  %v262_v27 = vpop.f32.mrb[3].mxu1 }
 0x1c4   :  { %v217_v28 = vadd.f32 %v215_v25, %v210_v26 }
 0x1c6   :  { %218 = vst [vmem:[#allocation2] sm:$0x3] %v217_v28 }
 0x1c7   :  { %290 = shalt.err (!%p287_p4)
}
 0x1c8   :  { %s291_s9 = scalar_lea.hbm %s388_s5, 32 }
 0x1c9   :  { %p292_p5 = scmp.ne.s32.totalorder %s388_s5, %s291_s9  ;;  %p295_p6 = scmp.lt.u32.totalorder %s291_s9, %s388_s5 }
 0x1cb   :  { %p297_p7 = pnand %p295_p6, %p292_p5 }
 0x1cd   :  { %300 = shalt.err (!%p297_p7)
}
 0x1ce   :  { %228 = dma.vmem_to_hbm [thread:$0]  %s226_s6, 32, %s388_s5, [#allocation3]  }
 0x1cf   :  { %301 = dma.done.wait [#allocation3], 32  }
 0x1d0   :  { %302 = vsyncadd [#allocation3], 4294967264 }
 0x1d1   :  { %232 = vsyncpa [#allocation3], 1 }

</bundles_post_ra>
